<compile_context>
chip_gen: v6e
topology: v6e:2x2x1
jax: 0.10.0
libtpu: 0.0.40
codegen_flags: <defaults>
</compile_context>

<pallas_src>
import functools

import jax
import jax.numpy as jnp
from jax.experimental import pallas as pl
from jax.experimental.pallas import tpu as pltpu


def _round_up(x, m):
    return ((x + m - 1) // m) * m


def _vmem_spec():
    return pl.BlockSpec(memory_space=pltpu.MemorySpace.VMEM)


# ---------------------------------------------------------------------------
# Fused backbone + fused classifier heads, gridded over the batch dimension.
#   feat = ReLU(x @ W1 + b1)                    (D -> F)    bf16 MXU, f32 acc
#   slab = feat @ [Wc | Wo | 0-pad] + bias      (F -> KPAD) lane-dense output
# slab[:, :K] = logits, slab[:, K:3K] = logits_open.
# ---------------------------------------------------------------------------
def fused_forward_kernel(x_ref, w1_ref, b1_ref, wh_ref, bh_ref, out_ref):
    feat = jnp.maximum(
        jnp.dot(x_ref[...], w1_ref[...], preferred_element_type=jnp.float32)
        + b1_ref[...], 0.0)                       # f32 elementwise (v5e-safe)
    out_ref[...] = (
        jnp.dot(feat.astype(jnp.bfloat16), wh_ref[...],
                preferred_element_type=jnp.float32) + bh_ref[...]
    ).astype(out_ref.dtype)


def fused_forward(x, w1, b1, wh, bh, *, tile_target=256):
    """x: (N, D) bf16. Returns padded (N_pad, KPAD) f32 logits slab."""
    n, d = x.shape
    f = w1.shape[1]
    kpad = wh.shape[1]
    # 256-row tile target: MXU-friendly on v6e/v7x (2x256x256) and fine on
    # v5e (4x128x128).  For very large D, shrink for v7x's 64 MiB VMEM.
    n8 = _round_up(n, 8)
    if n8 <= tile_target:
        tile_n, n_pad = n8, n8
    else:
        tile_n, n_pad = tile_target, _round_up(n, tile_target)
    if n_pad != n:
        x = jnp.concatenate([x, jnp.zeros((n_pad - n, d), x.dtype)], axis=0)

    flops = 2 * n_pad * (d * f + f * kpad)
    bytes_accessed = (n_pad * d * x.dtype.itemsize + d * f * 2 + f * 4
                      + f * kpad * 2 + kpad * 4 + n_pad * kpad * 4)
    return pl.pallas_call(
        fused_forward_kernel,
        out_shape=jax.ShapeDtypeStruct((n_pad, kpad), jnp.float32),
        grid=(n_pad // tile_n,),
        in_specs=[
            pl.BlockSpec((tile_n, d), lambda i: (i, 0)),
            pl.BlockSpec((d, f), lambda i: (0, 0)),       # weights pinned
            pl.BlockSpec((1, f), lambda i: (0, 0)),
            pl.BlockSpec((f, kpad), lambda i: (0, 0)),
            pl.BlockSpec((1, kpad), lambda i: (0, 0)),
        ],
        out_specs=pl.BlockSpec((tile_n, kpad), lambda i: (i, 0)),
        compiler_params=pltpu.CompilerParams(
            dimension_semantics=("parallel",)),
        cost_estimate=pl.CostEstimate(
            flops=flops, transcendentals=0,
            bytes_accessed=int(bytes_accessed)),
    )(x, w1, b1, wh, bh)


# ---------------------------------------------------------------------------
# All five losses from the single logits slab, packed into one (1, 8) output.
# Row layout of the slab (each section start is 8-row aligned):
#   [0, nl)                 : labeled weak+strong          (Lx, Lo)
#   [off_u1, off_u1+n_all)  : unlabeled-all weak           (L_oem, L_socr)
#   [off_u2, off_u2+n_all)  : unlabeled-all strong         (L_oem, L_socr)
#   [off_fw, off_fw+n_u)    : FixMatch weak   (if do_fix)  (pseudo-labels)
#   [off_fs, off_fs+n_u)    : FixMatch strong (if do_fix)  (L_fix)
# Column layout: [:k] = logits, [k:2k] = open ch0, [2k:3k] = open ch1.
# ---------------------------------------------------------------------------
def losses_kernel(slab_ref, tgt_ref, out_ref, *, nl, n_all, n_u, k,
                  off_u1, off_u2, off_fw, off_fs,
                  temperature, threshold, do_fix):
    eps = 1e-8
    slab = slab_ref[...]                                   # (N_pad, KPAD) f32

    # ----- Lx: mean cross-entropy on labeled weak+strong rows -----
    logits_lab = slab[0:nl, 0:k]
    iota_k = jax.lax.broadcasted_iota(jnp.int32, (nl, k), 1)
    onehot = (iota_k == tgt_ref[...]).astype(jnp.float32)   # tgt: (nl, 1)
    m = jnp.max(logits_lab, axis=-1, keepdims=True)
    z = logits_lab - m
    logp = z - jnp.log(jnp.sum(jnp.exp(z), axis=-1, keepdims=True))
    lx = jnp.mean(-jnp.sum(logp * onehot, axis=-1, keepdims=True),
                  keepdims=True)

    # ----- Lo: OVA loss, 2-way channel softmax in sigmoid form -----
    l0 = slab[0:nl, k:2 * k]
    l1 = slab[0:nl, 2 * k:3 * k]
    p1 = 1.0 / (1.0 + jnp.exp(l0 - l1))      # == softmax over the 2 channels
    p0 = 1.0 - p1
    open_loss = jnp.mean(
        jnp.sum(-jnp.log(p1 + eps) * onehot, axis=1, keepdims=True),
        keepdims=True)
    open_loss_neg = jnp.mean(
        jnp.max(-jnp.log(p0 + eps) * (1.0 - onehot), axis=1, keepdims=True),
        keepdims=True)
    lo = open_loss_neg + open_loss

    # ----- L_oem (ova_ent) and L_socr on the two unlabeled-all views -----
    u1_0 = slab[off_u1:off_u1 + n_all, k:2 * k]
    u1_1 = slab[off_u1:off_u1 + n_all, 2 * k:3 * k]
    u2_0 = slab[off_u2:off_u2 + n_all, k:2 * k]
    u2_1 = slab[off_u2:off_u2 + n_all, 2 * k:3 * k]
    q1a = 1.0 / (1.0 + jnp.exp(u1_0 - u1_1))
    q0a = 1.0 - q1a
    q1b = 1.0 / (1.0 + jnp.exp(u2_0 - u2_1))
    q0b = 1.0 - q1b

    def ova_ent(q0, q1):
        ent = -q0 * jnp.log(q0 + eps) - q1 * jnp.log(q1 + eps)
        return jnp.mean(jnp.mean(ent, axis=1, keepdims=True), keepdims=True)

    loem = 0.5 * ova_ent(q0a, q1a) + 0.5 * ova_ent(q0b, q1b)

    d0 = q0a - q0b
    d1 = q1a - q1b
    lsocr = jnp.mean(jnp.sum(d0 * d0 + d1 * d1, axis=1, keepdims=True),
                     keepdims=True)

    # ----- L_fix: FixMatch pseudo-label + confidence mask + masked CE -----
    if do_fix:
        # TODO(synk): stop_gradient on this pseudo-label path if differentiated.
        lw = slab[off_fw:off_fw + n_u, 0:k]
        ls = slab[off_fs:off_fs + n_u, 0:k]
        scaled = lw / temperature
        mw = jnp.max(scaled, axis=-1, keepdims=True)
        e = jnp.exp(scaled - mw)
        p = e / jnp.sum(e, axis=-1, keepdims=True)
        max_p = jnp.max(p, axis=-1, keepdims=True)
        iota_u = jax.lax.broadcasted_iota(jnp.int32, (n_u, k), 1)
        # first index attaining the max (torch.max index semantics)
        idx = jnp.min(jnp.where(p >= max_p, iota_u, k), axis=-1, keepdims=True)
        onehot_u = (iota_u == idx).astype(jnp.float32)
        mask = (max_p >= threshold).astype(jnp.float32)
        ms = jnp.max(ls, axis=-1, keepdims=True)
        zs = ls - ms
        logps = zs - jnp.log(jnp.sum(jnp.exp(zs), axis=-1, keepdims=True))
        nll = -jnp.sum(logps * onehot_u, axis=-1, keepdims=True)
        lfix = jnp.mean(nll * mask, keepdims=True)
    else:
        lfix = jnp.zeros((1, 1), jnp.float32)

    # Pack the five scalars into one lane vector -> single output store/DMA.
    lane = jax.lax.broadcasted_iota(jnp.int32, (1, 8), 1)
    out_ref[...] = (lx * (lane == 0).astype(jnp.float32)
                    + lo * (lane == 1).astype(jnp.float32)
                    + loem * (lane == 2).astype(jnp.float32)
                    + lsocr * (lane == 3).astype(jnp.float32)
                    + lfix * (lane == 4).astype(jnp.float32))


def compute_losses(slab, targets2, *, b, n_all, n_u, k, off_u1, off_u2,
                   off_fw, off_fs, temperature, threshold, do_fix):
    kern = functools.partial(
        losses_kernel, nl=2 * b, n_all=n_all, n_u=n_u, k=k,
        off_u1=off_u1, off_u2=off_u2, off_fw=off_fw, off_fs=off_fs,
        temperature=float(temperature), threshold=float(threshold),
        do_fix=bool(do_fix))
    return pl.pallas_call(
        kern,
        out_shape=jax.ShapeDtypeStruct((1, 8), jnp.float32),
        in_specs=[_vmem_spec(), _vmem_spec()],
        out_specs=_vmem_spec(),
    )(slab, targets2)


# ---------------------------------------------------------------------------
# OpenMatch forward wrapper (mirrors the PyTorch nn.Module.forward)
# ---------------------------------------------------------------------------
class OpenMatchPallas:
    def __init__(self, T, start_fix, lambda_oem, lambda_socr, threshold):
        self.T = T
        self.start_fix = start_fix
        self.lambda_oem = lambda_oem
        self.lambda_socr = lambda_socr
        self.threshold = threshold

    @staticmethod
    def _flatten(x):
        # NCHW -> (N, C*H*W) row-major; bf16 halves the input HBM/DMA bytes
        # and feeds the MXU at bf16 rate.
        return x.reshape(x.shape[0], -1).astype(jnp.bfloat16)

    def __call__(self, labeled_data, unlabeled_data, unlabeled_data_all,
                 params, epoch_info):
        (_, inputs_x_s, inputs_x), targets_x = labeled_data
        (inputs_u_w, inputs_u_s, _), _ = unlabeled_data
        (inputs_all_w, inputs_all_s, _), _ = unlabeled_data_all
        b = inputs_x.shape[0]
        n_all = inputs_all_w.shape[0]
        n_u = inputs_u_w.shape[0]
        k = params["k"]
        # NOTE: epoch must be a static Python value (matches the original
        # if-branch); wrap in lax.cond if a traced epoch is ever needed.
        do_fix = bool(epoch_info[0] >= self.start_fix)

        # Build the whole batch ONCE (single concat, 8-row-aligned sections)
        # so the backbone/heads run in a single pallas_call that also covers
        # the FixMatch views.
        sections = [
            jnp.concatenate(
                [self._flatten(inputs_x), self._flatten(inputs_x_s)], axis=0),
            self._flatten(inputs_all_w),
            self._flatten(inputs_all_s),
        ]
        if do_fix:
            sections += [self._flatten(inputs_u_w), self._flatten(inputs_u_s)]

        d = sections[0].shape[1]
        blocks, offsets, off = [], [], 0
        for sec in sections:
            offsets.append(off)
            rows = sec.shape[0]
            rows8 = _round_up(rows, 8)
            if rows8 != rows:
                sec = jnp.concatenate(
                    [sec, jnp.zeros((rows8 - rows, d), sec.dtype)], axis=0)
            blocks.append(sec)
            off += rows8
        x = jnp.concatenate(blocks, axis=0)

        slab = fused_forward(x, params["w1"], params["b1"],
                             params["wh"], params["bh"])

        off_u1, off_u2 = offsets[1], offsets[2]
        off_fw, off_fs = (offsets[3], offsets[4]) if do_fix else (0, 0)

        targets2 = jnp.concatenate([targets_x, targets_x], axis=0)  # .repeat(2)
        losses = compute_losses(
            slab, targets2.reshape(-1, 1).astype(jnp.int32),
            b=b, n_all=n_all, n_u=n_u, k=k,
            off_u1=off_u1, off_u2=off_u2, off_fw=off_fw, off_fs=off_fs,
            temperature=self.T, threshold=self.threshold, do_fix=do_fix)
        Lx = losses[0, 0]
        Lo = losses[0, 1]
        L_oem = losses[0, 2]
        L_socr = losses[0, 3]
        L_fix = losses[0, 4]          # == 0 when do_fix is False

        loss = (Lx + Lo + self.lambda_oem * L_oem
                + self.lambda_socr * L_socr + L_fix)
        return loss, Lx, Lo, L_oem, L_socr, L_fix, slab[:b, :k], targets_x


# ---------------------------------------------------------------------------
# Deterministic parameter / input construction + smoke test
# ---------------------------------------------------------------------------
def init_params(key, in_dim, feat_dim, num_classes):
    k1, k2, k3 = jax.random.split(key, 3)
    return {
        "w1": jax.random.normal(k1, (in_dim, feat_dim), jnp.float32) * 0.05,
        "b1": jnp.zeros((1, feat_dim), jnp.float32),
        "wc": jax.random.normal(k2, (feat_dim, num_classes), jnp.float32) * 0.05,
        "bc": jnp.zeros((1, num_classes), jnp.float32),
        "wo": jax.random.normal(k3, (feat_dim, 2 * num_classes), jnp.float32) * 0.05,
        "bo": jnp.zeros((1, 2 * num_classes), jnp.float32),
    }


def fuse_params(raw):
    """bf16 MXU weights; classifier + classifier_open fused into one
    lane-dense (F, KPAD) weight so the kernel does a single head matmul with
    unmasked 128-lane stores."""
    f, k = raw["wc"].shape
    k2 = raw["wo"].shape[1]
    kpad = max(128, _round_up(k + k2, 128))
    wh = jnp.zeros((f, kpad), jnp.float32)
    wh = wh.at[:, :k].set(raw["wc"]).at[:, k:k + k2].set(raw["wo"])
    bh = jnp.zeros((1, kpad), jnp.float32)
    bh = bh.at[:, :k].set(raw["bc"]).at[:, k:k + k2].set(raw["bo"])
    return {
        "w1": raw["w1"].astype(jnp.bfloat16),
        "b1": raw["b1"].astype(jnp.float32),
        "wh": wh.astype(jnp.bfloat16),
        "bh": bh,                       # bias stays f32 (added post-MXU)
        "k": k,
    }


if __name__ == "__main__":
    key = jax.random.PRNGKey(0)
    B, C, H, W = 2, 4, 8, 8          # labeled batch, NCHW images
    MU = 2                            # unlabeled ratio
    NUM_CLASSES = 8
    FEAT_DIM = 256
    IN_DIM = C * H * W

    keys = jax.random.split(key, 9)
    params = fuse_params(init_params(keys[0], IN_DIM, FEAT_DIM, NUM_CLASSES))

    def img(kk, n):
        return jax.random.normal(kk, (n, C, H, W), jnp.float32)

    inputs_x_w = img(keys[1], B)
    inputs_x_s = img(keys[2], B)
    inputs_x = img(keys[3], B)
    targets_x = jax.random.randint(keys[4], (B,), 0, NUM_CLASSES, jnp.int32)

    n_u = MU * B
    inputs_u_w = img(keys[5], n_u)
    inputs_u_s = img(keys[6], n_u)
    inputs_all_w = img(keys[7], n_u)
    inputs_all_s = img(keys[8], n_u)
    dummy_u = jnp.zeros((n_u, C, H, W), jnp.float32)
    dummy_t = jnp.zeros((n_u,), jnp.int32)

    labeled_data = ((inputs_x_w, inputs_x_s, inputs_x), targets_x)
    unlabeled_data = ((inputs_u_w, inputs_u_s, dummy_u), dummy_t)
    unlabeled_data_all = ((inputs_all_w, inputs_all_s, dummy_u), dummy_t)

    open_match = OpenMatchPallas(T=0.5, start_fix=0, lambda_oem=0.1,
                                 lambda_socr=0.5, threshold=0.5)
    epoch_info = (1, 0)   # epoch >= start_fix -> FixMatch branch exercised

    out = open_match(labeled_data, unlabeled_data, unlabeled_data_all,
                     params, epoch_info)
    out = jax.block_until_ready(out)
    loss, Lx, Lo, L_oem, L_socr, L_fix, logits_lab, tgt = out
    assert logits_lab.shape == (B, NUM_CLASSES)
    assert bool(jnp.isfinite(loss))
    print("KERNEL_OK")
</pallas_src>

<mosaic_0001>
module attributes {stable_mosaic.version = 11 : i64} {
  func.func @fused_forward_kernel(%arg0: i32, %arg1: memref<40x256xbf16, #tpu.memory_space<vmem>>, %arg2: memref<256x256xbf16, #tpu.memory_space<vmem>>, %arg3: memref<1x256xf32, #tpu.memory_space<vmem>>, %arg4: memref<256x128xbf16, #tpu.memory_space<vmem>>, %arg5: memref<1x128xf32, #tpu.memory_space<vmem>>, %arg6: memref<40x128xf32, #tpu.memory_space<vmem>>) attributes {dimension_semantics = [#tpu.dimension_semantics<parallel>], iteration_bounds = array<i64: 1>, scalar_prefetch = 0 : i64, scratch_operands = 0 : i64, tpu.core_type = #tpu.core_type<tc>, window_params = [{transform_indices = @transform_0, window_bounds = array<i64: 40, 256>}, {pipeline_mode = #tpu.pipeline_mode<synchronous>, transform_indices = @transform_1, window_bounds = array<i64: 256, 256>}, {pipeline_mode = #tpu.pipeline_mode<synchronous>, transform_indices = @transform_2, window_bounds = array<i64: 1, 256>}, {pipeline_mode = #tpu.pipeline_mode<synchronous>, transform_indices = @transform_3, window_bounds = array<i64: 256, 128>}, {pipeline_mode = #tpu.pipeline_mode<synchronous>, transform_indices = @transform_4, window_bounds = array<i64: 1, 128>}, {transform_indices = @transform_5, window_bounds = array<i64: 40, 128>}]} {
    %c0 = arith.constant 0 : index
    %c0_0 = arith.constant 0 : index
    %0 = vector.load %arg1[%c0, %c0_0] : memref<40x256xbf16, #tpu.memory_space<vmem>>, vector<40x256xbf16>
    %c0_1 = arith.constant 0 : index
    %c0_2 = arith.constant 0 : index
    %1 = vector.load %arg2[%c0_1, %c0_2] : memref<256x256xbf16, #tpu.memory_space<vmem>>, vector<256x256xbf16>
    %cst = arith.constant dense<0.000000e+00> : vector<40x256xf32>
    %2 = tpu.matmul %0, %1, %cst {dimension_numbers = #tpu.dot_dimension_numbers<[1], [0], [0], [1], [0, 0, 1, 1], [], []>} : vector<40x256xbf16>, vector<256x256xbf16>, vector<40x256xf32> -> vector<40x256xf32>
    %c0_3 = arith.constant 0 : index
    %c0_4 = arith.constant 0 : index
    %3 = vector.load %arg3[%c0_3, %c0_4] : memref<1x256xf32, #tpu.memory_space<vmem>>, vector<1x256xf32>
    %4 = vector.broadcast %3 : vector<1x256xf32> to vector<40x256xf32>
    %5 = arith.addf %2, %4 : vector<40x256xf32>
    %cst_5 = arith.constant 0.000000e+00 : f32
    %6 = vector.broadcast %cst_5 : f32 to vector<40x256xf32>
    %7 = arith.maximumf %5, %6 : vector<40x256xf32>
    %8 = arith.truncf %7 : vector<40x256xf32> to vector<40x256xbf16>
    %c0_6 = arith.constant 0 : index
    %c0_7 = arith.constant 0 : index
    %9 = vector.load %arg4[%c0_6, %c0_7] : memref<256x128xbf16, #tpu.memory_space<vmem>>, vector<256x128xbf16>
    %cst_8 = arith.constant dense<0.000000e+00> : vector<40x128xf32>
    %10 = tpu.matmul %8, %9, %cst_8 {dimension_numbers = #tpu.dot_dimension_numbers<[1], [0], [0], [1], [0, 0, 1, 1], [], []>} : vector<40x256xbf16>, vector<256x128xbf16>, vector<40x128xf32> -> vector<40x128xf32>
    %c0_9 = arith.constant 0 : index
    %c0_10 = arith.constant 0 : index
    %11 = vector.load %arg5[%c0_9, %c0_10] : memref<1x128xf32, #tpu.memory_space<vmem>>, vector<1x128xf32>
    %12 = vector.broadcast %11 : vector<1x128xf32> to vector<40x128xf32>
    %13 = arith.addf %10, %12 : vector<40x128xf32>
    %c0_11 = arith.constant 0 : index
    %c0_12 = arith.constant 0 : index
    %14 = vector.load %arg6[%c0_11, %c0_12] : memref<40x128xf32, #tpu.memory_space<vmem>>, vector<40x128xf32>
    tpu.vector_store %arg6[%c0_11, %c0_12], %13 {strides = array<i32>} : memref<40x128xf32, #tpu.memory_space<vmem>>, vector<40x128xf32>,
    return
  }
  func.func @transform_0(%arg0: i32) -> (i32, i32) {
    %c0_i32 = arith.constant 0 : i32
    %c0_i32_0 = arith.constant 0 : i32
    return %arg0, %c0_i32 : i32, i32
  }
  func.func @transform_1(%arg0: i32) -> (i32, i32) {
    %c0_i32 = arith.constant 0 : i32
    %c0_i32_0 = arith.constant 0 : i32
    %c0_i32_1 = arith.constant 0 : i32
    return %c0_i32, %c0_i32_0 : i32, i32
  }
  func.func @transform_2(%arg0: i32) -> (i32, i32) {
    %c0_i32 = arith.constant 0 : i32
    %c0_i32_0 = arith.constant 0 : i32
    %c0_i32_1 = arith.constant 0 : i32
    return %c0_i32, %c0_i32_0 : i32, i32
  }
  func.func @transform_3(%arg0: i32) -> (i32, i32) {
    %c0_i32 = arith.constant 0 : i32
    %c0_i32_0 = arith.constant 0 : i32
    %c0_i32_1 = arith.constant 0 : i32
    return %c0_i32, %c0_i32_0 : i32, i32
  }
  func.func @transform_4(%arg0: i32) -> (i32, i32) {
    %c0_i32 = arith.constant 0 : i32
    %c0_i32_0 = arith.constant 0 : i32
    %c0_i32_1 = arith.constant 0 : i32
    return %c0_i32, %c0_i32_0 : i32, i32
  }
  func.func @transform_5(%arg0: i32) -> (i32, i32) {
    %c0_i32 = arith.constant 0 : i32
    %c0_i32_0 = arith.constant 0 : i32
    return %arg0, %c0_i32 : i32, i32
  }
}

</mosaic_0001>

<bundles_post_ra>
// kernel: tpu_custom_call.1
= control target key start
LH: loop header
LB: loop body
LE: loop exit
PB: predicated region body
PF: predicated region fallthrough
CT: control target
= control target key end

     0   :  { %10 = vsyncpa [#allocation3], 0  ;;  %s910_s0 = inlined_call_operand.hbm [shape: bf16[40,256], index: 0, kind: input, shape index: {}]   ;;  %s911_s1 = inlined_call_operand.hbm [shape: bf16[256,256], index: 1, kind: input, shape index: {}]   ;;  %s912_s2 = inlined_call_operand.vmem [shape: f32[1,256], index: 2, kind: input, shape index: {}]   ;;  %s913_s3 = inlined_call_operand.hbm [shape: bf16[256,128], index: 3, kind: input, shape index: {}]   ;;  %s914_s4 = inlined_call_operand.vmem [shape: f32[1,128], index: 4, kind: input, shape index: {}]   ;;  %s915_s5 = inlined_call_operand.hbm [shape: f32[40,128], index: 5, kind: output, shape index: {}]  }
   0x1   :  { %11 = vsyncpa [#allocation6], 0 }
   0x2   :  { %12 = vsyncpa [#allocation4], 0  ;;  %s845_s18 = smov [#allocation5]   ;;  %s846_s20 = smov [#allocation2]  }
   0x3   :  { %s30_s19 = sshll.u32 %s845_s18, 4  ;;  %s18_s21 = sshll.u32 %s846_s20, 4  ;;  %s31_s19 = int_to_ptr.vmem [resolvable:$true] %s30_s19  ;;  %s19_s21 = int_to_ptr.vmem [resolvable:$true] %s18_s21 }
   0x4   :  { %s767_s22 = scalar_lea.vmem %s31_s19, 4096  ;;  %p772_p1 = scmp.lt.s32.totalorder %s31_s19, %s31_s19 }
   0x5   :  { %p768_p0 = scmp.ne.s32.totalorder %s31_s19, %s767_s22  ;;  %p773_p2 = scmp.lt.s32.totalorder %s767_s22, %s767_s22 }
   0x7   :  { %p774_p3 = por %p773_p2, %p772_p1 }
   0x9   :  { %p775_p4 = pnand %p774_p3, %p768_p0 }
   0xb   :  { %778 = shalt.err (!%p775_p4)
}
   0xc   :  { %s847_s23 = smov 128   ;;  %s848_s24 = smov 8  }
   0xd   :  { %36 = dma.hbm_to_vmem [thread:$0]  %s911_s1, 4096, %s31_s19, [#allocation6], %s847_s23, %s847_s23, %s848_s24  }
   0xe   :  { %s787_s27 = scalar_lea.vmem %s19_s21, 640  ;;  %p792_p6 = scmp.lt.s32.totalorder %s19_s21, %s19_s21 }
   0xf   :  { %p788_p5 = scmp.ne.s32.totalorder %s19_s21, %s787_s27  ;;  %p793_p7 = scmp.lt.s32.totalorder %s787_s27, %s787_s27 }
  0x11   :  { %p794_p8 = por %p793_p7, %p792_p6 }
  0x13   :  { %p795_p9 = pnand %p794_p8, %p788_p5 }
  0x15   :  { %798 = shalt.err (!%p795_p9)
}
  0x16   :  { %24 = dma.hbm_to_vmem [thread:$0]  %s910_s0, 640, %s19_s21, [#allocation3], %s847_s23, %s847_s23, %s848_s24  }
  0x17   :  { %s849_s30 = smov [#allocation7]  }
  0x18   :  { %s44_s6 = sshll.u32 %s849_s30, 4  ;;  %s45_s6 = int_to_ptr.vmem [resolvable:$true] %s44_s6 }
  0x19   :  { %s807_s7 = scalar_lea.vmem %s45_s6, 2048  ;;  %p812_p11 = scmp.lt.s32.totalorder %s45_s6, %s45_s6 }
  0x1a   :  { %p808_p10 = scmp.ne.s32.totalorder %s45_s6, %s807_s7  ;;  %p813_p12 = scmp.lt.s32.totalorder %s807_s7, %s807_s7 }
  0x1c   :  { %p814_p13 = por %p813_p12, %p812_p11 }
  0x1e   :  { %p815_p0 = pnand %p814_p13, %p808_p10 }
  0x20   :  { %818 = shalt.err (!%p815_p0)
}
  0x21   :  { %s850_s1 = smov 64   ;;  %s851_s8 = smov 4  }
  0x22   :  { %50 = dma.hbm_to_vmem [thread:$0]  %s913_s3, 2048, %s45_s6, [#allocation6], %s850_s1, %s850_s1, %s851_s8  }
  0x23   :  { %839 = dma.done.wait [#allocation3], 640  }
  0x24   :  { %840 = vsyncadd [#allocation3], 4294966656 }
  0x25   :  { %841 = dma.done.wait [#allocation6], 6144  }
  0x26   :  { %842 = vsyncadd [#allocation6], 4294961152  ;;  %v687_v0 = vld [vmem:[#allocation5 + $0x74] ss:$8 sps:$4 sm:$0xff]   ;;  %v689_v1 = vld [vmem:[#allocation5 + $0x70] ss:$8 sps:$4 sm:$0xff]   ;;  %v102_v55 = vlaneseq }
  0x27   :  { %299 = vmatprep.subr.bf16.mxu0 %v687_v0  ;;  %v690_v2 = vld [vmem:[#allocation5 + $0x64] ss:$8 sps:$4 sm:$0xff]   ;;  %v692_v3 = vld [vmem:[#allocation5 + $0x60] ss:$8 sps:$4 sm:$0xff]   ;;  %v693_v4 = vld [vmem:[#allocation5 + $0x54] ss:$8 sps:$4 sm:$0xff]  }
  0x28   :  { %300 = vmatpush1.bf16.msra.mxu0 %v689_v1  ;;  %v695_v5 = vld [vmem:[#allocation5 + $0x50] ss:$8 sps:$4 sm:$0xff]   ;;  %v696_v6 = vld [vmem:[#allocation5 + $0x44] ss:$8 sps:$4 sm:$0xff]   ;;  %v698_v7 = vld [vmem:[#allocation5 + $0x40] ss:$8 sps:$4 sm:$0xff]  }
  0x29   :  { %301 = vmatprep.subr.bf16.mxu0 %v690_v2  ;;  %v699_v8 = vld [vmem:[#allocation5 + $0x34] ss:$8 sps:$4 sm:$0xff]   ;;  %v701_v9 = vld [vmem:[#allocation5 + $0x30] ss:$8 sps:$4 sm:$0xff]   ;;  %v702_v10 = vld [vmem:[#allocation5 + $0x24] ss:$8 sps:$4 sm:$0xff]  }
  0x2a   :  { %v704_v11 = vld [vmem:[#allocation5 + $0x20] ss:$8 sps:$4 sm:$0xff]   ;;  %v705_v12 = vld [vmem:[#allocation5 + $0x14] ss:$8 sps:$4 sm:$0xff]   ;;  %v707_v14 = vld [vmem:[#allocation5 + $0x10] ss:$8 sps:$4 sm:$0xff]  }
  0x2b   :  { %v737_v13 = vld [vmem:[#allocation2 + $0x4] ss:$8 sps:$4 sm:$0xff]   ;;  %v710_v16 = vld [vmem:[#allocation5] ss:$8 sps:$4 sm:$0xff]   ;;  %v745_v20 = vld [vmem:[#allocation7 + $0x70] sm:$0xff]   ;;  %v103_v56 = vshrl.u32 %v102_v55, 7 }
  0x2c   :  { %302 = vmatpush1.bf16.msra.mxu0 %v692_v3  ;;  %v708_v15 = vld [vmem:[#allocation5 + $0x4] ss:$8 sps:$4 sm:$0xff]   ;;  %331 = vmatprep.mubr.bf16.mxu0 %v737_v13  ;;  %v743_v17 = vld [vmem:[#allocation7 + $0x78] sm:$0xff]   ;;  %v746_v21 = vld [vmem:[#allocation7 + $0x30] sm:$0xff]  }
  0x2d   :  { %303 = vmatprep.subr.bf16.mxu0 %v693_v4  ;;  %v711_v18 = vld [vmem:[#allocation5 + $0xf4] ss:$8 sps:$4 sm:$0xff]   ;;  %645 = vmatprep.subr.bf16.mxu1 %v743_v17  ;;  %v747_v22 = vld [vmem:[#allocation7 + $0x68] sm:$0xff]   ;;  %v713_v23 = vld [vmem:[#allocation5 + $0xf0] ss:$8 sps:$4 sm:$0xff]   ;;  %v108_v57 = vsub.s32 1, %v103_v56 }
  0x2e   :  { %v744_v19 = vld [vmem:[#allocation7 + $0x38] sm:$0xff]   ;;  %v714_v24 = vld [vmem:[#allocation5 + $0xe4] ss:$8 sps:$4 sm:$0xff]   ;;  %v716_v26 = vld [vmem:[#allocation5 + $0xe0] ss:$8 sps:$4 sm:$0xff]   ;;  %v104_v58 = vsub.s32 0, %v103_v56 }
  0x2f   :  { %646 = vmatpush3.bf16.msra.mxu1 %v744_v19  ;;  %v748_v25 = vld [vmem:[#allocation7 + $0x28] sm:$0xff]   ;;  %v749_v27 = vld [vmem:[#allocation7 + $0x60] sm:$0xff]   ;;  %v717_v28 = vld [vmem:[#allocation5 + $0xd4] ss:$8 sps:$4 sm:$0xff]  }
  0x30   :  { %304 = vmatpush1.bf16.msra.mxu0 %v695_v5  ;;  %647 = vmatprep.subr.bf16.mxu1 %v745_v20  ;;  %v750_v29 = vld [vmem:[#allocation7 + $0x20] sm:$0xff]   ;;  %v751_v30 = vld [vmem:[#allocation7 + $0x58] sm:$0xff]   ;;  %v738_v44 = vld [vmem:[#allocation2 + $0x14] ss:$8 sps:$4 sm:$0xff]  }
  0x31   :  { %305 = vmatprep.subr.bf16.mxu0 %v696_v6  ;;  %v719_v31 = vld [vmem:[#allocation5 + $0xd0] ss:$8 sps:$4 sm:$0xff]   ;;  %v720_v32 = vld [vmem:[#allocation5 + $0xc4] ss:$8 sps:$4 sm:$0xff]   ;;  %v722_v34 = vld [vmem:[#allocation5 + $0xc0] ss:$8 sps:$4 sm:$0xff]  }
  0x32   :  { %v752_v33 = vld [vmem:[#allocation7 + $0x18] sm:$0xff]   ;;  %v726_v37 = vld [vmem:[#allocation5 + $0xa4] ss:$8 sps:$4 sm:$0xff]   ;;  %v728_v38 = vld [vmem:[#allocation5 + $0xa0] ss:$8 sps:$4 sm:$0xff]  }
  0x33   :  { %648 = vmatpush3.bf16.msra.mxu1 %v746_v21  ;;  %v723_v35 = vld [vmem:[#allocation5 + $0xb4] ss:$8 sps:$4 sm:$0xff]   ;;  %v725_v36 = vld [vmem:[#allocation5 + $0xb0] ss:$8 sps:$4 sm:$0xff]   ;;  %v732_v41 = vld [vmem:[#allocation5 + $0x84] ss:$8 sps:$4 sm:$0xff]  }
  0x34   :  { %306 = vmatpush1.bf16.msra.mxu0 %v698_v7  ;;  %649 = vmatprep.subr.bf16.mxu1 %v747_v22  ;;  %v729_v39 = vld [vmem:[#allocation5 + $0x94] ss:$8 sps:$4 sm:$0xff]   ;;  %v731_v40 = vld [vmem:[#allocation5 + $0x90] ss:$8 sps:$4 sm:$0xff]   ;;  %v734_v42 = vld [vmem:[#allocation5 + $0x80] ss:$8 sps:$4 sm:$0xff]  }
  0x35   :  { %307 = vmatprep.subr.bf16.mxu0 %v699_v8  ;;  %v735_v43 = vld [vmem:[#allocation2] ss:$8 sps:$4 sm:$0xff]   ;;  %v740_v46 = vld [vmem:[#allocation2 + $0x10] ss:$8 sps:$4 sm:$0xff]  }
  0x36   :  { %v67_v45 = vld [vmem:[#allocation2 + $0x20] sm:$0xff]  ;;  %v753_v49 = vld [vmem:[#allocation7 + $0x50] sm:$0xff]   ;;  %v755_v51 = vld [vmem:[#allocation7 + $0x48] sm:$0xff]  }
  0x37   :  { %650 = vmatpush3.bf16.msra.mxu1 %v748_v25  ;;  %v595_v47 = vcombine.high %v67_v45, %v67_v45  ;;  %v594_v48 = vcombine.low %v67_v45, %v67_v45  ;;  %v754_v50 = vld [vmem:[#allocation7 + $0x10] sm:$0xff]   ;;  %v756_v52 = vld [vmem:[#allocation7 + $0x8] sm:$0xff]   ;;  %v757_v53 = vld [vmem:[#allocation7 + $0x40] sm:$0xff]  }
  0x38   :  { %308 = vmatpush1.bf16.msra.mxu0 %v701_v9  ;;  %651 = vmatprep.subr.bf16.mxu1 %v749_v27  ;;  %v758_v54 = vld [vmem:[#allocation7] sm:$0xff]   ;;  %v100_v59 = vld [vmem:[%s912_s2] sm:$0x3] }
  0x39   :  { %309 = vmatprep.subr.bf16.mxu0 %v702_v10  ;;  %v109_v61 = vrot.slane %v100_v59, %v108_v57  ;;  %v105_v62 = vrot.slane %v100_v59, %v104_v58 }
  0x3b   :  { %652 = vmatpush3.bf16.msra.mxu1 %v750_v29 }
  0x3c   :  { %310 = vmatpush1.bf16.msra.mxu0 %v704_v11  ;;  %653 = vmatprep.subr.bf16.mxu1 %v751_v30 }
  0x3d   :  { %311 = vmatprep.subr.bf16.mxu0 %v705_v12 }
  0x3f   :  { %654 = vmatpush3.bf16.msra.mxu1 %v752_v33 }
  0x40   :  { %312 = vmatpush1.bf16.msra.mxu0 %v707_v14  ;;  %655 = vmatprep.subr.bf16.mxu1 %v753_v49 }
  0x41   :  { %313 = vmatprep.subr.bf16.mxu0 %v708_v15 }
  0x43   :  { %656 = vmatpush3.bf16.msra.mxu1 %v754_v50 }
  0x44   :  { %314 = vmatpush1.bf16.msra.mxu0 %v710_v16  ;;  %657 = vmatprep.subr.bf16.mxu1 %v755_v51 }
  0x45   :  { %315 = vmatprep.subr.bf16.mxu0 %v711_v18 }
  0x47   :  { %658 = vmatpush3.bf16.msra.mxu1 %v756_v52 }
  0x48   :  { %316 = vmatpush2.bf16.msra.mxu0 %v713_v23  ;;  %659 = vmatprep.subr.bf16.mxu1 %v757_v53 }
  0x49   :  { %317 = vmatprep.subr.bf16.mxu0 %v714_v24 }
  0x4b   :  { %660 = vmatpush3.bf16.msra.mxu1 %v758_v54 }
  0x4c   :  { %318 = vmatpush2.bf16.msra.mxu0 %v716_v26 }
  0x4d   :  { %319 = vmatprep.subr.bf16.mxu0 %v717_v28 }
  0x50   :  { %320 = vmatpush2.bf16.msra.mxu0 %v719_v31 }
  0x51   :  { %321 = vmatprep.subr.bf16.mxu0 %v720_v32 }
  0x54   :  { %322 = vmatpush2.bf16.msra.mxu0 %v722_v34 }
  0x55   :  { %323 = vmatprep.subr.bf16.mxu0 %v723_v35 }
  0x58   :  { %324 = vmatpush2.bf16.msra.mxu0 %v725_v36 }
  0x59   :  { %325 = vmatprep.subr.bf16.mxu0 %v726_v37  ;;  %v628_v37 = vld [vmem:[%s914_s4] ss:$0 sm:$0xff]  ;;  %s852_s4 = smov [#allocation8]  }
  0x5a   :  { %s577_s12 = sshll.u32 %s852_s4, 4  ;;  %s578_s12 = int_to_ptr.vmem [resolvable:$true] %s577_s12 }
  0x5b   :  { %s819_s13 = scalar_lea.vmem %s578_s12, 640  ;;  %p824_p2 = scmp.lt.s32.totalorder %s578_s12, %s578_s12 }
  0x5c   :  { %326 = vmatpush2.bf16.msra.mxu0 %v728_v38  ;;  %p820_p1 = scmp.ne.s32.totalorder %s578_s12, %s819_s13  ;;  %p825_p3 = scmp.lt.s32.totalorder %s819_s13, %s819_s13 }
  0x5d   :  { %327 = vmatprep.subr.bf16.mxu0 %v729_v39 }
  0x5e   :  { %p826_p4 = por %p825_p3, %p824_p2 }
  0x60   :  { %328 = vmatpush2.bf16.msra.mxu0 %v731_v40  ;;  %p827_p5 = pnand %p826_p4, %p820_p1 }
  0x61   :  { %329 = vmatprep.subr.bf16.mxu0 %v732_v41 }
  0x64   :  { %330 = vmatpush2.bf16.msra.mxu0 %v734_v42 }
  0x67   :  { %332 = vmatmul.mubr.bf16.vlgmr.msra.gmra.mxu0 %v735_v43 }
  0x68   :  { %341 = vmatprep.mubr.bf16.mxu0 %v738_v44 }
  0x6f   :  { %342 = vmatmul.mubr.bf16.gmra.mxu0 %v740_v46 }
  0x70   :  { %351 = vmatprep.mubr.bf16.mxu0 %v595_v47 }
  0x77   :  { %352 = vmatmul.mubr.bf16.gmra.mxu0 %v594_v48 }
 0x127   :  { %v333_v60 = vpop.f32.mrf.mxu0 }
 0x128   :  { %v334_v3 = vadd.f32 %v333_v60, %v105_v62 }
 0x129   :  { %v335_v63 = vpop.f32.mrf.mxu0 }
 0x12a   :  { %v336_v1 = vadd.f32 %v335_v63, %v109_v61  ;;  %v360_v10 = vmax.f32 %v334_v3, 0.0 }
 0x12b   :  { %v337_v0 = vpop.f32.mrf.mxu0 }
 0x12c   :  { %v338_v2 = vadd.f32 %v337_v0, %v105_v62  ;;  %v361_v8 = vmax.f32 %v336_v1, 0.0 }
 0x12d   :  { %v339_v4 = vpop.f32.mrf.mxu0 }
 0x12e   :  { %v340_v5 = vadd.f32 %v339_v4, %v109_v61  ;;  %v362_v6 = vmax.f32 %v338_v2, 0.0 }
 0x12f   :  { %v343_v7 = vpop.f32.mrf.mxu0 }
 0x130   :  { %v363_v9 = vmax.f32 %v340_v5, 0.0  ;;  %v370_v13 = vpack.c.bf16 %v362_v6, %v360_v10  ;;  %v344_v17 = vadd.f32 %v343_v7, %v105_v62 }
 0x131   :  { %v345_v11 = vpop.f32.mrf.mxu0 }
 0x132   :  { %v371_v12 = vpack.c.bf16 %v363_v9, %v361_v8  ;;  %v346_v15 = vadd.f32 %v345_v11, %v109_v61  ;;  %v364_v24 = vmax.f32 %v344_v17, 0.0 }
 0x133   :  { %v347_v14 = vpop.f32.mrf.mxu0 }
 0x134   :  { %v348_v16 = vadd.f32 %v347_v14, %v105_v62  ;;  %543 = vmatprep.mubr.bf16.mxu1 %v371_v12  ;;  %v365_v22 = vmax.f32 %v346_v15, 0.0 }
 0x135   :  { %v349_v18 = vpop.f32.mrf.mxu0  ;;  %544 = vmatmul.mubr.bf16.vlgmr.msra.gmra.mxu1 %v370_v13 }
 0x136   :  { %v350_v19 = vadd.f32 %v349_v18, %v109_v61  ;;  %v366_v20 = vmax.f32 %v348_v16, 0.0 }
 0x137   :  { %v353_v21 = vpop.f32.mrf.mxu0 }
 0x138   :  { %v367_v23 = vmax.f32 %v350_v19, 0.0  ;;  %v372_v28 = vpack.c.bf16 %v366_v20, %v364_v24  ;;  %v354_v29 = vadd.f32 %v353_v21, %v105_v62 }
 0x139   :  { %v355_v25 = vpop.f32.mrf.mxu0 }
 0x13a   :  { %v373_v26 = vpack.c.bf16 %v367_v23, %v365_v22  ;;  %v356_v27 = vadd.f32 %v355_v25, %v109_v61  ;;  %v368_v34 = vmax.f32 %v354_v29, 0.0 }
 0x13b   :  { %v357_v30 = vpop.f32.mrf.mxu0 }
 0x13c   :  { %v369_v31 = vmax.f32 %v356_v27, 0.0  ;;  %551 = vmatprep.mubr.bf16.mxu1 %v373_v26  ;;  %v374_v35 = vpack.c.bf16 %v368_v34, %v368_v34 }
 0x13d   :  { %v358_v32 = vpop.f32.mrf.mxu0  ;;  %552 = vmatmul.mubr.bf16.gmra.mxu1 %v372_v28 }
 0x13e   :  { %v375_v33 = vpack.c.bf16 %v369_v31, %v369_v31 }
 0x140   :  { %559 = vmatprep.mubr.bf16.mxu1 %v375_v33 }
 0x145   :  { %560 = vmatmul.mubr.bf16.gmra.mxu1 %v374_v35 }
 0x1f5   :  { %v661_v36 = vpop.f32.mrf.mxu1 }
 0x1f7   :  { %v662_v38 = vpop.f32.mrf.mxu1 }
 0x1f8   :  { %v663_v39 = vadd.f32 %v662_v38, %v661_v36 }
 0x1f9   :  { %v664_v40 = vpop.f32.mrf.mxu1 }
 0x1fa   :  { %v546_v41 = vadd.f32 %v663_v39, %v628_v37 }
 0x1fb   :  { %v665_v42 = vpop.f32.mrf.mxu1 }
 0x1fc   :  { %567 = vst [vmem:[#allocation8] sm:$0xff] %v546_v41  ;;  %v666_v43 = vadd.f32 %v665_v42, %v664_v40 }
 0x1fd   :  { %v667_v44 = vpop.f32.mrf.mxu1 }
 0x1fe   :  { %v549_v45 = vadd.f32 %v666_v43, %v628_v37 }
 0x1ff   :  { %v668_v46 = vpop.f32.mrf.mxu1 }
 0x200   :  { %568 = vst [vmem:[#allocation8 + $0x8] sm:$0xff] %v549_v45  ;;  %v669_v47 = vadd.f32 %v668_v46, %v667_v44 }
 0x201   :  { %v670_v48 = vpop.f32.mrf.mxu1 }
 0x202   :  { %v554_v49 = vadd.f32 %v669_v47, %v628_v37 }
 0x203   :  { %v671_v50 = vpop.f32.mrf.mxu1 }
 0x204   :  { %569 = vst [vmem:[#allocation8 + $0x10] sm:$0xff] %v554_v49  ;;  %v672_v51 = vadd.f32 %v671_v50, %v670_v48 }
 0x205   :  { %v673_v52 = vpop.f32.mrf.mxu1 }
 0x206   :  { %v557_v53 = vadd.f32 %v672_v51, %v628_v37 }
 0x207   :  { %v674_v54 = vpop.f32.mrf.mxu1 }
 0x208   :  { %570 = vst [vmem:[#allocation8 + $0x18] sm:$0xff] %v557_v53  ;;  %v675_v55 = vadd.f32 %v674_v54, %v673_v52 }
 0x209   :  { %v676_v56 = vpop.f32.mrf.mxu1 }
 0x20a   :  { %v562_v57 = vadd.f32 %v675_v55, %v628_v37 }
 0x20b   :  { %v677_v58 = vpop.f32.mrf.mxu1 }
 0x20c   :  { %571 = vst [vmem:[#allocation8 + $0x20] sm:$0xff] %v562_v57 }
 0x20d   :  { %830 = shalt.err (!%p827_p5)
}
 0x20e   :  { %583 = dma.vmem_to_hbm [thread:$0]  %s578_s12, 640, %s915_s5, [#allocation4], %s847_s23, %s847_s23, %s848_s24  }
 0x20f   :  { %843 = dma.done.wait [#allocation4], 640  }
 0x210   :  { %844 = vsyncadd [#allocation4], 4294966656 }
 0x211   :  { %587 = vsyncpa [#allocation3], 1 }
 0x212   :  { %588 = vsyncpa [#allocation6], 1 }
 0x213   :  { %589 = vsyncpa [#allocation4], 1 }

</bundles_post_ra>
